<compile_context>
chip_gen: v5e
topology: v5e:2x2
jax: 0.10.0
libtpu: 0.0.40
codegen_flags: <defaults>
</compile_context>

<pallas_src>
import jax
import jax.numpy as jnp
from jax import lax
from jax.experimental import pallas as pl
from jax.experimental.pallas import tpu as pltpu

# --- model / problem sizes (small, consistent with the module) ---
V, E, H, D0, L = 64, 32, 32, 32, 4   # vocab, embed, lstm hidden, linear_0, labels
S, B = 8, 2                          # seq_len, batch
G4 = 4 * H                           # 128 gate lanes
LANES = 128

# --- packed-slab row offsets (all 8-aligned so static slices stay cheap) ----
ROW_WHH = 0                 # rows [  0,  32): W_hh^T, g-gate cols pre-doubled
ROW_W0 = H                  # rows [ 32,  64): linear_0 weight, padded to 128 lanes
ROW_B0 = 2 * H              # row    64      : linear_0 bias,   padded to 128 lanes
ROW_WO = 72                 # rows [ 72, 200): output weight padded to (128,128)
ROW_BO = ROW_WO + LANES     # row   200      : output bias,     padded to 128 lanes
SLAB_ROWS = 208             # (208, 128) f32  = 104 KiB


def classifier_kernel(xproj_ref, slab_ref, out_ref, hbuf_ref):
    """LSTM recurrence (register-carried h/c) + hoisted MLP head.

    xproj_ref : (S*B, 4H)  pre-gathered, pre-biased input projections
                           (g-gate cols already scaled by 2, see pack_params)
    slab_ref  : (208, 128) packed [W_hh^T | W0 | b0 | Wo | bo] parameter slab
    out_ref   : (S*B, 128) logits in cols [0, L), zeros elsewhere (lane-dense)
    hbuf_ref  : (S*B, H)   VMEM scratch holding the stacked hidden states
    """
    whh = slab_ref[ROW_WHH:ROW_WHH + H, :]                         # (H, 4H)

    # Pre-slice per-step input projections (static slices, off the critical path).
    xp = [xproj_ref[t * B:(t + 1) * B, :] for t in range(S)]

    # ---- sequential recurrence; h/c live in registers ----------------------
    h = jnp.zeros((B, H), jnp.float32)
    c = jnp.zeros((B, H), jnp.float32)
    for t in range(S):                                   # statically unrolled
        gates = xp[t] + jnp.dot(h, whh, preferred_element_type=jnp.float32)
        # Single EUP push over the full (B, 4H) vreg; the g-gate pre-activation
        # was pre-doubled so tanh(x) = 2*sigmoid(2x) - 1 recovers the cell gate.
        sg = jax.nn.sigmoid(gates)
        i_g = sg[:, 0:H]                     # input gate
        f_g = sg[:, H:2 * H]                 # forget gate
        g_g = 2.0 * sg[:, 2 * H:3 * H] - 1.0  # cell gate  (== tanh of original)
        o_g = sg[:, 3 * H:4 * H]             # output gate
        c = f_g * c + i_g * g_g
        h = o_g * jnp.tanh(c)                # second (unavoidable) EUP push
        hbuf_ref[t * B:(t + 1) * B, :] = h   # idle vst slot, off critical path

    # ---- MLP head hoisted out of the loop, one lane-dense (16,128) store ---
    h_all = hbuf_ref[...]                                          # (S*B, H)
    w0 = slab_ref[ROW_W0:ROW_W0 + H, :]                            # (H, 128)
    b0 = slab_ref[ROW_B0:ROW_B0 + 1, :]                            # (1, 128)
    wo = slab_ref[ROW_WO:ROW_WO + LANES, :]                        # (128, 128)
    bo = slab_ref[ROW_BO:ROW_BO + 1, :]                            # (1, 128)

    z = jnp.maximum(
        jnp.dot(h_all, w0, preferred_element_type=jnp.float32) + b0, 0.0)
    y = jnp.dot(z, wo, preferred_element_type=jnp.float32) + bo
    out_ref[...] = y.astype(out_ref.dtype)


def init_params(key):
    """Deterministic synthetic parameters (PyTorch-style uniform init)."""
    ks = jax.random.split(key, 9)
    k_lstm = 1.0 / jnp.sqrt(H)
    k_lin0 = 1.0 / jnp.sqrt(H)
    k_out = 1.0 / jnp.sqrt(D0)
    emb = jax.random.normal(ks[0], (V, E), jnp.float32)
    wih_t = jax.random.uniform(ks[1], (E, 4 * H), jnp.float32, -k_lstm, k_lstm)
    whh_t = jax.random.uniform(ks[2], (H, 4 * H), jnp.float32, -k_lstm, k_lstm)
    b_ih = jax.random.uniform(ks[3], (1, 4 * H), jnp.float32, -k_lstm, k_lstm)
    b_hh = jax.random.uniform(ks[4], (1, 4 * H), jnp.float32, -k_lstm, k_lstm)
    w0_t = jax.random.uniform(ks[5], (H, D0), jnp.float32, -k_lin0, k_lin0)
    b0 = jax.random.uniform(ks[6], (1, D0), jnp.float32, -k_lin0, k_lin0)
    wo_t = jax.random.uniform(ks[7], (D0, L), jnp.float32, -k_out, k_out)
    bo = jax.random.uniform(ks[8], (1, L), jnp.float32, -k_out, k_out)
    return emb, wih_t, whh_t, b_ih + b_hh, w0_t, b0, wo_t, bo


def pack_params(params):
    """One-time parameter-build-time packing (NOT per call):
    - fold Embedding @ W_ih^T + (b_ih + b_hh) into a (V, 4H) lookup table,
    - pre-double the g-gate columns (tanh(x) = 2*sigmoid(2x) - 1 trick),
    - pack all remaining weights/biases into a single lane-dense (208,128) slab.
    """
    emb, wih_t, whh_t, b, w0_t, b0, wo_t, bo = params
    table = emb @ wih_t + b                                        # (V, 4H)
    gscale = jnp.ones((1, 4 * H), jnp.float32).at[:, 2 * H:3 * H].set(2.0)
    table = table * gscale
    whh_s = whh_t * gscale

    slab = jnp.zeros((SLAB_ROWS, LANES), jnp.float32)
    slab = slab.at[ROW_WHH:ROW_WHH + H, :].set(whh_s)
    slab = slab.at[ROW_W0:ROW_W0 + H, :D0].set(w0_t)
    slab = slab.at[ROW_B0, :D0].set(b0[0])
    slab = slab.at[ROW_WO:ROW_WO + D0, :L].set(wo_t)
    slab = slab.at[ROW_BO, :L].set(bo[0])
    return table, slab


@jax.jit
def classifier_forward(tokens, packed):
    table, slab = packed
    # Embedding lookup == gather of pre-projected rows (glue).
    # NOTE: jnp.take clamps out-of-range ids instead of erroring like nn.Embedding.
    x_proj = jnp.take(table, tokens.reshape(-1), axis=0)          # (S*B, 4H)
    out = pl.pallas_call(
        classifier_kernel,
        out_shape=jax.ShapeDtypeStruct((S * B, LANES), jnp.float32),
        in_specs=[pl.BlockSpec(memory_space=pltpu.MemorySpace.VMEM)] * 2,
        out_specs=pl.BlockSpec(memory_space=pltpu.MemorySpace.VMEM),
        scratch_shapes=[pltpu.VMEM((S * B, H), jnp.float32)],
    )(x_proj, slab)
    return out[:, :L].reshape(S, B, L)


def reference_forward(tokens, params):
    """Pure-JAX reference for correctness (mirrors the PyTorch module)."""
    emb, wih_t, whh_t, b, w0_t, b0, wo_t, bo = params
    x = jnp.take(emb, tokens, axis=0)

    def step(carry, x_t):
        h, c = carry
        gates = x_t @ wih_t + h @ whh_t + b
        i_g = jax.nn.sigmoid(gates[:, :H])
        f_g = jax.nn.sigmoid(gates[:, H:2 * H])
        g_g = jnp.tanh(gates[:, 2 * H:3 * H])
        o_g = jax.nn.sigmoid(gates[:, 3 * H:4 * H])
        c = f_g * c + i_g * g_g
        h = o_g * jnp.tanh(c)
        z = jnp.maximum(h @ w0_t + b0, 0.0)
        return (h, c), z @ wo_t + bo

    init = (jnp.zeros((B, H), jnp.float32), jnp.zeros((B, H), jnp.float32))
    _, ys = lax.scan(step, init, x)
    return ys


if __name__ == "__main__":
    key = jax.random.PRNGKey(0)
    k_tok, k_par = jax.random.split(key)
    tokens = jax.random.randint(k_tok, (S, B), 0, V, dtype=jnp.int32)
    params = init_params(k_par)
    packed = pack_params(params)          # one-time fold/pack at init

    out = classifier_forward(tokens, packed)
    out = jax.block_until_ready(out)

    ref = reference_forward(tokens, params)
    assert out.shape == (S, B, L)
    assert jnp.allclose(out, ref, rtol=1e-4, atol=1e-4), "mismatch vs JAX reference"

    print("KERNEL_OK")
</pallas_src>

<mosaic_0001>
module attributes {stable_mosaic.version = 11 : i64} {
  func.func @classifier_kernel(%arg0: memref<16x128xf32, #tpu.memory_space<vmem>>, %arg1: memref<208x128xf32, #tpu.memory_space<vmem>>, %arg2: memref<16x128xf32, #tpu.memory_space<vmem>>, %arg3: memref<16x32xf32, #tpu.memory_space<vmem>>) attributes {dimension_semantics = [], scalar_prefetch = 0 : i64, scratch_operands = 1 : i64, tpu.core_type = #tpu.core_type<tc>} {
    %c0 = arith.constant 0 : index
    %c0_0 = arith.constant 0 : index
    %0 = vector.load %arg1[%c0, %c0_0] : memref<208x128xf32, #tpu.memory_space<vmem>>, vector<32x128xf32>
    %c0_1 = arith.constant 0 : index
    %c0_2 = arith.constant 0 : index
    %1 = vector.load %arg0[%c0_1, %c0_2] : memref<16x128xf32, #tpu.memory_space<vmem>>, vector<2x128xf32>
    %c2 = arith.constant 2 : index
    %c0_3 = arith.constant 0 : index
    %2 = vector.load %arg0[%c2, %c0_3] : memref<16x128xf32, #tpu.memory_space<vmem>>, vector<2x128xf32>
    %c4 = arith.constant 4 : index
    %c0_4 = arith.constant 0 : index
    %3 = vector.load %arg0[%c4, %c0_4] : memref<16x128xf32, #tpu.memory_space<vmem>>, vector<2x128xf32>
    %c6 = arith.constant 6 : index
    %c0_5 = arith.constant 0 : index
    %4 = vector.load %arg0[%c6, %c0_5] : memref<16x128xf32, #tpu.memory_space<vmem>>, vector<2x128xf32>
    %c8 = arith.constant 8 : index
    %c0_6 = arith.constant 0 : index
    %5 = vector.load %arg0[%c8, %c0_6] : memref<16x128xf32, #tpu.memory_space<vmem>>, vector<2x128xf32>
    %c10 = arith.constant 10 : index
    %c0_7 = arith.constant 0 : index
    %6 = vector.load %arg0[%c10, %c0_7] : memref<16x128xf32, #tpu.memory_space<vmem>>, vector<2x128xf32>
    %c12 = arith.constant 12 : index
    %c0_8 = arith.constant 0 : index
    %7 = vector.load %arg0[%c12, %c0_8] : memref<16x128xf32, #tpu.memory_space<vmem>>, vector<2x128xf32>
    %c14 = arith.constant 14 : index
    %c0_9 = arith.constant 0 : index
    %8 = vector.load %arg0[%c14, %c0_9] : memref<16x128xf32, #tpu.memory_space<vmem>>, vector<2x128xf32>
    %cst = arith.constant 0.000000e+00 : f32
    %9 = vector.broadcast %cst : f32 to vector<2x32xf32>
    %cst_10 = arith.constant 0.000000e+00 : f32
    %10 = vector.broadcast %cst_10 : f32 to vector<2x32xf32>
    %cst_11 = arith.constant dense<0.000000e+00> : vector<2x128xf32>
    %11 = tpu.matmul %9, %0, %cst_11 {dimension_numbers = #tpu.dot_dimension_numbers<[1], [0], [0], [1], [0, 0, 1, 1], [], []>} : vector<2x32xf32>, vector<32x128xf32>, vector<2x128xf32> -> vector<2x128xf32>
    %12 = arith.addf %1, %11 : vector<2x128xf32>
    %13 = arith.negf %12 : vector<2x128xf32>
    %14 = math.exp %13 : vector<2x128xf32>
    %cst_12 = arith.constant 1.000000e+00 : f32
    %15 = vector.broadcast %cst_12 : f32 to vector<2x128xf32>
    %16 = arith.addf %15, %14 : vector<2x128xf32>
    %17 = arith.divf %15, %16 : vector<2x128xf32>
    %18 = vector.extract_strided_slice %17 {offsets = [0, 0], sizes = [2, 32], strides = [1, 1]} : vector<2x128xf32> to vector<2x32xf32>
    %19 = vector.extract_strided_slice %17 {offsets = [0, 32], sizes = [2, 32], strides = [1, 1]} : vector<2x128xf32> to vector<2x32xf32>
    %20 = vector.extract_strided_slice %17 {offsets = [0, 64], sizes = [2, 32], strides = [1, 1]} : vector<2x128xf32> to vector<2x32xf32>
    %cst_13 = arith.constant 2.000000e+00 : f32
    %21 = vector.broadcast %cst_13 : f32 to vector<2x32xf32>
    %22 = arith.mulf %21, %20 : vector<2x32xf32>
    %cst_14 = arith.constant 1.000000e+00 : f32
    %23 = vector.broadcast %cst_14 : f32 to vector<2x32xf32>
    %24 = arith.subf %22, %23 : vector<2x32xf32>
    %25 = vector.extract_strided_slice %17 {offsets = [0, 96], sizes = [2, 32], strides = [1, 1]} : vector<2x128xf32> to vector<2x32xf32>
    %26 = arith.mulf %19, %10 : vector<2x32xf32>
    %27 = arith.mulf %18, %24 : vector<2x32xf32>
    %28 = arith.addf %26, %27 : vector<2x32xf32>
    %29 = math.tanh %28 : vector<2x32xf32>
    %30 = arith.mulf %25, %29 : vector<2x32xf32>
    %c0_15 = arith.constant 0 : index
    %c0_16 = arith.constant 0 : index
    %31 = vector.load %arg3[%c0_15, %c0_16] : memref<16x32xf32, #tpu.memory_space<vmem>>, vector<2x32xf32>
    tpu.vector_store %arg3[%c0_15, %c0_16], %30 {strides = array<i32>} : memref<16x32xf32, #tpu.memory_space<vmem>>, vector<2x32xf32>,
    %cst_17 = arith.constant dense<0.000000e+00> : vector<2x128xf32>
    %32 = tpu.matmul %30, %0, %cst_17 {dimension_numbers = #tpu.dot_dimension_numbers<[1], [0], [0], [1], [0, 0, 1, 1], [], []>} : vector<2x32xf32>, vector<32x128xf32>, vector<2x128xf32> -> vector<2x128xf32>
    %33 = arith.addf %2, %32 : vector<2x128xf32>
    %34 = arith.negf %33 : vector<2x128xf32>
    %35 = math.exp %34 : vector<2x128xf32>
    %cst_18 = arith.constant 1.000000e+00 : f32
    %36 = vector.broadcast %cst_18 : f32 to vector<2x128xf32>
    %37 = arith.addf %36, %35 : vector<2x128xf32>
    %38 = arith.divf %36, %37 : vector<2x128xf32>
    %39 = vector.extract_strided_slice %38 {offsets = [0, 0], sizes = [2, 32], strides = [1, 1]} : vector<2x128xf32> to vector<2x32xf32>
    %40 = vector.extract_strided_slice %38 {offsets = [0, 32], sizes = [2, 32], strides = [1, 1]} : vector<2x128xf32> to vector<2x32xf32>
    %41 = vector.extract_strided_slice %38 {offsets = [0, 64], sizes = [2, 32], strides = [1, 1]} : vector<2x128xf32> to vector<2x32xf32>
    %cst_19 = arith.constant 2.000000e+00 : f32
    %42 = vector.broadcast %cst_19 : f32 to vector<2x32xf32>
    %43 = arith.mulf %42, %41 : vector<2x32xf32>
    %cst_20 = arith.constant 1.000000e+00 : f32
    %44 = vector.broadcast %cst_20 : f32 to vector<2x32xf32>
    %45 = arith.subf %43, %44 : vector<2x32xf32>
    %46 = vector.extract_strided_slice %38 {offsets = [0, 96], sizes = [2, 32], strides = [1, 1]} : vector<2x128xf32> to vector<2x32xf32>
    %47 = arith.mulf %40, %28 : vector<2x32xf32>
    %48 = arith.mulf %39, %45 : vector<2x32xf32>
    %49 = arith.addf %47, %48 : vector<2x32xf32>
    %50 = math.tanh %49 : vector<2x32xf32>
    %51 = arith.mulf %46, %50 : vector<2x32xf32>
    %c2_21 = arith.constant 2 : index
    %c0_22 = arith.constant 0 : index
    %52 = vector.load %arg3[%c2_21, %c0_22] : memref<16x32xf32, #tpu.memory_space<vmem>>, vector<2x32xf32>
    tpu.vector_store %arg3[%c2_21, %c0_22], %51 {strides = array<i32>} : memref<16x32xf32, #tpu.memory_space<vmem>>, vector<2x32xf32>,
    %cst_23 = arith.constant dense<0.000000e+00> : vector<2x128xf32>
    %53 = tpu.matmul %51, %0, %cst_23 {dimension_numbers = #tpu.dot_dimension_numbers<[1], [0], [0], [1], [0, 0, 1, 1], [], []>} : vector<2x32xf32>, vector<32x128xf32>, vector<2x128xf32> -> vector<2x128xf32>
    %54 = arith.addf %3, %53 : vector<2x128xf32>
    %55 = arith.negf %54 : vector<2x128xf32>
    %56 = math.exp %55 : vector<2x128xf32>
    %cst_24 = arith.constant 1.000000e+00 : f32
    %57 = vector.broadcast %cst_24 : f32 to vector<2x128xf32>
    %58 = arith.addf %57, %56 : vector<2x128xf32>
    %59 = arith.divf %57, %58 : vector<2x128xf32>
    %60 = vector.extract_strided_slice %59 {offsets = [0, 0], sizes = [2, 32], strides = [1, 1]} : vector<2x128xf32> to vector<2x32xf32>
    %61 = vector.extract_strided_slice %59 {offsets = [0, 32], sizes = [2, 32], strides = [1, 1]} : vector<2x128xf32> to vector<2x32xf32>
    %62 = vector.extract_strided_slice %59 {offsets = [0, 64], sizes = [2, 32], strides = [1, 1]} : vector<2x128xf32> to vector<2x32xf32>
    %cst_25 = arith.constant 2.000000e+00 : f32
    %63 = vector.broadcast %cst_25 : f32 to vector<2x32xf32>
    %64 = arith.mulf %63, %62 : vector<2x32xf32>
    %cst_26 = arith.constant 1.000000e+00 : f32
    %65 = vector.broadcast %cst_26 : f32 to vector<2x32xf32>
    %66 = arith.subf %64, %65 : vector<2x32xf32>
    %67 = vector.extract_strided_slice %59 {offsets = [0, 96], sizes = [2, 32], strides = [1, 1]} : vector<2x128xf32> to vector<2x32xf32>
    %68 = arith.mulf %61, %49 : vector<2x32xf32>
    %69 = arith.mulf %60, %66 : vector<2x32xf32>
    %70 = arith.addf %68, %69 : vector<2x32xf32>
    %71 = math.tanh %70 : vector<2x32xf32>
    %72 = arith.mulf %67, %71 : vector<2x32xf32>
    %c4_27 = arith.constant 4 : index
    %c0_28 = arith.constant 0 : index
    %73 = vector.load %arg3[%c4_27, %c0_28] : memref<16x32xf32, #tpu.memory_space<vmem>>, vector<2x32xf32>
    tpu.vector_store %arg3[%c4_27, %c0_28], %72 {strides = array<i32>} : memref<16x32xf32, #tpu.memory_space<vmem>>, vector<2x32xf32>,
    %cst_29 = arith.constant dense<0.000000e+00> : vector<2x128xf32>
    %74 = tpu.matmul %72, %0, %cst_29 {dimension_numbers = #tpu.dot_dimension_numbers<[1], [0], [0], [1], [0, 0, 1, 1], [], []>} : vector<2x32xf32>, vector<32x128xf32>, vector<2x128xf32> -> vector<2x128xf32>
    %75 = arith.addf %4, %74 : vector<2x128xf32>
    %76 = arith.negf %75 : vector<2x128xf32>
    %77 = math.exp %76 : vector<2x128xf32>
    %cst_30 = arith.constant 1.000000e+00 : f32
    %78 = vector.broadcast %cst_30 : f32 to vector<2x128xf32>
    %79 = arith.addf %78, %77 : vector<2x128xf32>
    %80 = arith.divf %78, %79 : vector<2x128xf32>
    %81 = vector.extract_strided_slice %80 {offsets = [0, 0], sizes = [2, 32], strides = [1, 1]} : vector<2x128xf32> to vector<2x32xf32>
    %82 = vector.extract_strided_slice %80 {offsets = [0, 32], sizes = [2, 32], strides = [1, 1]} : vector<2x128xf32> to vector<2x32xf32>
    %83 = vector.extract_strided_slice %80 {offsets = [0, 64], sizes = [2, 32], strides = [1, 1]} : vector<2x128xf32> to vector<2x32xf32>
    %cst_31 = arith.constant 2.000000e+00 : f32
    %84 = vector.broadcast %cst_31 : f32 to vector<2x32xf32>
    %85 = arith.mulf %84, %83 : vector<2x32xf32>
    %cst_32 = arith.constant 1.000000e+00 : f32
    %86 = vector.broadcast %cst_32 : f32 to vector<2x32xf32>
    %87 = arith.subf %85, %86 : vector<2x32xf32>
    %88 = vector.extract_strided_slice %80 {offsets = [0, 96], sizes = [2, 32], strides = [1, 1]} : vector<2x128xf32> to vector<2x32xf32>
    %89 = arith.mulf %82, %70 : vector<2x32xf32>
    %90 = arith.mulf %81, %87 : vector<2x32xf32>
    %91 = arith.addf %89, %90 : vector<2x32xf32>
    %92 = math.tanh %91 : vector<2x32xf32>
    %93 = arith.mulf %88, %92 : vector<2x32xf32>
    %c6_33 = arith.constant 6 : index
    %c0_34 = arith.constant 0 : index
    %94 = vector.load %arg3[%c6_33, %c0_34] : memref<16x32xf32, #tpu.memory_space<vmem>>, vector<2x32xf32>
    tpu.vector_store %arg3[%c6_33, %c0_34], %93 {strides = array<i32>} : memref<16x32xf32, #tpu.memory_space<vmem>>, vector<2x32xf32>,
    %cst_35 = arith.constant dense<0.000000e+00> : vector<2x128xf32>
    %95 = tpu.matmul %93, %0, %cst_35 {dimension_numbers = #tpu.dot_dimension_numbers<[1], [0], [0], [1], [0, 0, 1, 1], [], []>} : vector<2x32xf32>, vector<32x128xf32>, vector<2x128xf32> -> vector<2x128xf32>
    %96 = arith.addf %5, %95 : vector<2x128xf32>
    %97 = arith.negf %96 : vector<2x128xf32>
    %98 = math.exp %97 : vector<2x128xf32>
    %cst_36 = arith.constant 1.000000e+00 : f32
    %99 = vector.broadcast %cst_36 : f32 to vector<2x128xf32>
    %100 = arith.addf %99, %98 : vector<2x128xf32>
    %101 = arith.divf %99, %100 : vector<2x128xf32>
    %102 = vector.extract_strided_slice %101 {offsets = [0, 0], sizes = [2, 32], strides = [1, 1]} : vector<2x128xf32> to vector<2x32xf32>
    %103 = vector.extract_strided_slice %101 {offsets = [0, 32], sizes = [2, 32], strides = [1, 1]} : vector<2x128xf32> to vector<2x32xf32>
    %104 = vector.extract_strided_slice %101 {offsets = [0, 64], sizes = [2, 32], strides = [1, 1]} : vector<2x128xf32> to vector<2x32xf32>
    %cst_37 = arith.constant 2.000000e+00 : f32
    %105 = vector.broadcast %cst_37 : f32 to vector<2x32xf32>
    %106 = arith.mulf %105, %104 : vector<2x32xf32>
    %cst_38 = arith.constant 1.000000e+00 : f32
    %107 = vector.broadcast %cst_38 : f32 to vector<2x32xf32>
    %108 = arith.subf %106, %107 : vector<2x32xf32>
    %109 = vector.extract_strided_slice %101 {offsets = [0, 96], sizes = [2, 32], strides = [1, 1]} : vector<2x128xf32> to vector<2x32xf32>
    %110 = arith.mulf %103, %91 : vector<2x32xf32>
    %111 = arith.mulf %102, %108 : vector<2x32xf32>
    %112 = arith.addf %110, %111 : vector<2x32xf32>
    %113 = math.tanh %112 : vector<2x32xf32>
    %114 = arith.mulf %109, %113 : vector<2x32xf32>
    %c8_39 = arith.constant 8 : index
    %c0_40 = arith.constant 0 : index
    %115 = vector.load %arg3[%c8_39, %c0_40] : memref<16x32xf32, #tpu.memory_space<vmem>>, vector<2x32xf32>
    tpu.vector_store %arg3[%c8_39, %c0_40], %114 {strides = array<i32>} : memref<16x32xf32, #tpu.memory_space<vmem>>, vector<2x32xf32>,
    %cst_41 = arith.constant dense<0.000000e+00> : vector<2x128xf32>
    %116 = tpu.matmul %114, %0, %cst_41 {dimension_numbers = #tpu.dot_dimension_numbers<[1], [0], [0], [1], [0, 0, 1, 1], [], []>} : vector<2x32xf32>, vector<32x128xf32>, vector<2x128xf32> -> vector<2x128xf32>
    %117 = arith.addf %6, %116 : vector<2x128xf32>
    %118 = arith.negf %117 : vector<2x128xf32>
    %119 = math.exp %118 : vector<2x128xf32>
    %cst_42 = arith.constant 1.000000e+00 : f32
    %120 = vector.broadcast %cst_42 : f32 to vector<2x128xf32>
    %121 = arith.addf %120, %119 : vector<2x128xf32>
    %122 = arith.divf %120, %121 : vector<2x128xf32>
    %123 = vector.extract_strided_slice %122 {offsets = [0, 0], sizes = [2, 32], strides = [1, 1]} : vector<2x128xf32> to vector<2x32xf32>
    %124 = vector.extract_strided_slice %122 {offsets = [0, 32], sizes = [2, 32], strides = [1, 1]} : vector<2x128xf32> to vector<2x32xf32>
    %125 = vector.extract_strided_slice %122 {offsets = [0, 64], sizes = [2, 32], strides = [1, 1]} : vector<2x128xf32> to vector<2x32xf32>
    %cst_43 = arith.constant 2.000000e+00 : f32
    %126 = vector.broadcast %cst_43 : f32 to vector<2x32xf32>
    %127 = arith.mulf %126, %125 : vector<2x32xf32>
    %cst_44 = arith.constant 1.000000e+00 : f32
    %128 = vector.broadcast %cst_44 : f32 to vector<2x32xf32>
    %129 = arith.subf %127, %128 : vector<2x32xf32>
    %130 = vector.extract_strided_slice %122 {offsets = [0, 96], sizes = [2, 32], strides = [1, 1]} : vector<2x128xf32> to vector<2x32xf32>
    %131 = arith.mulf %124, %112 : vector<2x32xf32>
    %132 = arith.mulf %123, %129 : vector<2x32xf32>
    %133 = arith.addf %131, %132 : vector<2x32xf32>
    %134 = math.tanh %133 : vector<2x32xf32>
    %135 = arith.mulf %130, %134 : vector<2x32xf32>
    %c10_45 = arith.constant 10 : index
    %c0_46 = arith.constant 0 : index
    %136 = vector.load %arg3[%c10_45, %c0_46] : memref<16x32xf32, #tpu.memory_space<vmem>>, vector<2x32xf32>
    tpu.vector_store %arg3[%c10_45, %c0_46], %135 {strides = array<i32>} : memref<16x32xf32, #tpu.memory_space<vmem>>, vector<2x32xf32>,
    %cst_47 = arith.constant dense<0.000000e+00> : vector<2x128xf32>
    %137 = tpu.matmul %135, %0, %cst_47 {dimension_numbers = #tpu.dot_dimension_numbers<[1], [0], [0], [1], [0, 0, 1, 1], [], []>} : vector<2x32xf32>, vector<32x128xf32>, vector<2x128xf32> -> vector<2x128xf32>
    %138 = arith.addf %7, %137 : vector<2x128xf32>
    %139 = arith.negf %138 : vector<2x128xf32>
    %140 = math.exp %139 : vector<2x128xf32>
    %cst_48 = arith.constant 1.000000e+00 : f32
    %141 = vector.broadcast %cst_48 : f32 to vector<2x128xf32>
    %142 = arith.addf %141, %140 : vector<2x128xf32>
    %143 = arith.divf %141, %142 : vector<2x128xf32>
    %144 = vector.extract_strided_slice %143 {offsets = [0, 0], sizes = [2, 32], strides = [1, 1]} : vector<2x128xf32> to vector<2x32xf32>
    %145 = vector.extract_strided_slice %143 {offsets = [0, 32], sizes = [2, 32], strides = [1, 1]} : vector<2x128xf32> to vector<2x32xf32>
    %146 = vector.extract_strided_slice %143 {offsets = [0, 64], sizes = [2, 32], strides = [1, 1]} : vector<2x128xf32> to vector<2x32xf32>
    %cst_49 = arith.constant 2.000000e+00 : f32
    %147 = vector.broadcast %cst_49 : f32 to vector<2x32xf32>
    %148 = arith.mulf %147, %146 : vector<2x32xf32>
    %cst_50 = arith.constant 1.000000e+00 : f32
    %149 = vector.broadcast %cst_50 : f32 to vector<2x32xf32>
    %150 = arith.subf %148, %149 : vector<2x32xf32>
    %151 = vector.extract_strided_slice %143 {offsets = [0, 96], sizes = [2, 32], strides = [1, 1]} : vector<2x128xf32> to vector<2x32xf32>
    %152 = arith.mulf %145, %133 : vector<2x32xf32>
    %153 = arith.mulf %144, %150 : vector<2x32xf32>
    %154 = arith.addf %152, %153 : vector<2x32xf32>
    %155 = math.tanh %154 : vector<2x32xf32>
    %156 = arith.mulf %151, %155 : vector<2x32xf32>
    %c12_51 = arith.constant 12 : index
    %c0_52 = arith.constant 0 : index
    %157 = vector.load %arg3[%c12_51, %c0_52] : memref<16x32xf32, #tpu.memory_space<vmem>>, vector<2x32xf32>
    tpu.vector_store %arg3[%c12_51, %c0_52], %156 {strides = array<i32>} : memref<16x32xf32, #tpu.memory_space<vmem>>, vector<2x32xf32>,
    %cst_53 = arith.constant dense<0.000000e+00> : vector<2x128xf32>
    %158 = tpu.matmul %156, %0, %cst_53 {dimension_numbers = #tpu.dot_dimension_numbers<[1], [0], [0], [1], [0, 0, 1, 1], [], []>} : vector<2x32xf32>, vector<32x128xf32>, vector<2x128xf32> -> vector<2x128xf32>
    %159 = arith.addf %8, %158 : vector<2x128xf32>
    %160 = arith.negf %159 : vector<2x128xf32>
    %161 = math.exp %160 : vector<2x128xf32>
    %cst_54 = arith.constant 1.000000e+00 : f32
    %162 = vector.broadcast %cst_54 : f32 to vector<2x128xf32>
    %163 = arith.addf %162, %161 : vector<2x128xf32>
    %164 = arith.divf %162, %163 : vector<2x128xf32>
    %165 = vector.extract_strided_slice %164 {offsets = [0, 0], sizes = [2, 32], strides = [1, 1]} : vector<2x128xf32> to vector<2x32xf32>
    %166 = vector.extract_strided_slice %164 {offsets = [0, 32], sizes = [2, 32], strides = [1, 1]} : vector<2x128xf32> to vector<2x32xf32>
    %167 = vector.extract_strided_slice %164 {offsets = [0, 64], sizes = [2, 32], strides = [1, 1]} : vector<2x128xf32> to vector<2x32xf32>
    %cst_55 = arith.constant 2.000000e+00 : f32
    %168 = vector.broadcast %cst_55 : f32 to vector<2x32xf32>
    %169 = arith.mulf %168, %167 : vector<2x32xf32>
    %cst_56 = arith.constant 1.000000e+00 : f32
    %170 = vector.broadcast %cst_56 : f32 to vector<2x32xf32>
    %171 = arith.subf %169, %170 : vector<2x32xf32>
    %172 = vector.extract_strided_slice %164 {offsets = [0, 96], sizes = [2, 32], strides = [1, 1]} : vector<2x128xf32> to vector<2x32xf32>
    %173 = arith.mulf %166, %154 : vector<2x32xf32>
    %174 = arith.mulf %165, %171 : vector<2x32xf32>
    %175 = arith.addf %173, %174 : vector<2x32xf32>
    %176 = math.tanh %175 : vector<2x32xf32>
    %177 = arith.mulf %172, %176 : vector<2x32xf32>
    %c14_57 = arith.constant 14 : index
    %c0_58 = arith.constant 0 : index
    %178 = vector.load %arg3[%c14_57, %c0_58] : memref<16x32xf32, #tpu.memory_space<vmem>>, vector<2x32xf32>
    tpu.vector_store %arg3[%c14_57, %c0_58], %177 {strides = array<i32>} : memref<16x32xf32, #tpu.memory_space<vmem>>, vector<2x32xf32>,
    %c0_59 = arith.constant 0 : index
    %c0_60 = arith.constant 0 : index
    %179 = vector.load %arg3[%c0_59, %c0_60] : memref<16x32xf32, #tpu.memory_space<vmem>>, vector<16x32xf32>
    %c32 = arith.constant 32 : index
    %c0_61 = arith.constant 0 : index
    %180 = vector.load %arg1[%c32, %c0_61] : memref<208x128xf32, #tpu.memory_space<vmem>>, vector<32x128xf32>
    %c64 = arith.constant 64 : index
    %c0_62 = arith.constant 0 : index
    %181 = vector.load %arg1[%c64, %c0_62] : memref<208x128xf32, #tpu.memory_space<vmem>>, vector<1x128xf32>
    %c72 = arith.constant 72 : index
    %c0_63 = arith.constant 0 : index
    %182 = vector.load %arg1[%c72, %c0_63] : memref<208x128xf32, #tpu.memory_space<vmem>>, vector<128x128xf32>
    %c200 = arith.constant 200 : index
    %c0_64 = arith.constant 0 : index
    %183 = vector.load %arg1[%c200, %c0_64] : memref<208x128xf32, #tpu.memory_space<vmem>>, vector<1x128xf32>
    %cst_65 = arith.constant dense<0.000000e+00> : vector<16x128xf32>
    %184 = tpu.matmul %179, %180, %cst_65 {dimension_numbers = #tpu.dot_dimension_numbers<[1], [0], [0], [1], [0, 0, 1, 1], [], []>} : vector<16x32xf32>, vector<32x128xf32>, vector<16x128xf32> -> vector<16x128xf32>
    %185 = vector.broadcast %181 : vector<1x128xf32> to vector<16x128xf32>
    %186 = arith.addf %184, %185 : vector<16x128xf32>
    %cst_66 = arith.constant 0.000000e+00 : f32
    %187 = vector.broadcast %cst_66 : f32 to vector<16x128xf32>
    %188 = arith.maximumf %186, %187 : vector<16x128xf32>
    %cst_67 = arith.constant dense<0.000000e+00> : vector<16x128xf32>
    %189 = tpu.matmul %188, %182, %cst_67 {dimension_numbers = #tpu.dot_dimension_numbers<[1], [0], [0], [1], [0, 0, 1, 1], [], []>} : vector<16x128xf32>, vector<128x128xf32>, vector<16x128xf32> -> vector<16x128xf32>
    %190 = vector.broadcast %183 : vector<1x128xf32> to vector<16x128xf32>
    %191 = arith.addf %189, %190 : vector<16x128xf32>
    %c0_68 = arith.constant 0 : index
    %c0_69 = arith.constant 0 : index
    %192 = vector.load %arg2[%c0_68, %c0_69] : memref<16x128xf32, #tpu.memory_space<vmem>>, vector<16x128xf32>
    tpu.vector_store %arg2[%c0_68, %c0_69], %191 {strides = array<i32>} : memref<16x128xf32, #tpu.memory_space<vmem>>, vector<16x128xf32>,
    return
  }
}

</mosaic_0001>

<bundles_post_ra>
// kernel: classifier_forward.1
= control target key start
LH: loop header
LB: loop body
LE: loop exit
PB: predicated region body
PF: predicated region fallthrough
CT: control target
= control target key end

     0   :  { %v718_v4 = vmov 0.0   ;;  %s719_s19 = smov 64   ;;  %s720_s20 = smov 32   ;;  %vm90_vm4 = vcmask 254976   ;;  %vm23_vm5 = vcmask 261120   ;;  %s945_s1 = inlined_call_operand.vmem [shape: f32[208,128], index: 1, kind: input, shape index: {}]   ;;  %s946_s0 = inlined_call_operand.vmem [shape: f32[16,128], index: 0, kind: input, shape index: {}]   ;;  %s947_s2 = inlined_call_operand.vmem [shape: f32[16,128], index: 2, kind: output, shape index: {}]  }
   0x1   :  { %v739_v0 = vld [vmem:[%s945_s1 + $0x18] sm:$0xff]  ;;  %v744_v1 = vld [vmem:[%s945_s1 + $0x10] sm:$0xff]  ;;  %v751_v2 = vld [vmem:[%s945_s1 + $0x8] sm:$0xff] }
   0x2   :  { %39 = vmatpush.msra.mxu0 %v739_v0  ;;  %106 = vmatpush.msra.mxu2 %v739_v0  ;;  %v759_v3 = vld [vmem:[%s945_s1] sm:$0xff] }
   0x3   :  { %238 = vmatpush.msra.mxu3 %v739_v0  ;;  %v15_v5 = vld [vmem:[%s946_s0] sm:$0x3]  ;;  %v16_v32 = vld [vmem:[%s946_s0 + $0x2] sm:$0x3]  ;;  %v17_v59 = vld [vmem:[%s946_s0 + $0x4] sm:$0x3] }
   0x4   :  { %40 = vmatpush.msra.mxu0 %v744_v1  ;;  %107 = vmatpush.msra.mxu2 %v744_v1 }
   0x5   :  { %239 = vmatpush.msra.mxu3 %v744_v1 }
   0x6   :  { %41 = vmatpush.msra.mxu0 %v751_v2  ;;  %108 = vmatpush.msra.mxu2 %v751_v2 }
   0x7   :  { %240 = vmatpush.msra.mxu3 %v751_v2 }
   0x8   :  { %42 = vmatpush.msra.mxu0 %v759_v3  ;;  %109 = vmatpush.msra.mxu2 %v759_v3 }
   0x9   :  { %43 = vmatmul.f32.vlgmr.msra.gmra.mxu0 %v718_v4  ;;  %241 = vmatpush.msra.mxu3 %v759_v3 }
   0xa   :  { %172 = vmatpush.msrb.mxu2 %v739_v0  ;;  %304 = vmatpush.msrb.mxu0 %v739_v0 }
   0xb   :  { %370 = vmatpush.msrb.mxu3 %v739_v0 }
   0xc   :  { %173 = vmatpush.msrb.mxu2 %v744_v1  ;;  %305 = vmatpush.msrb.mxu0 %v744_v1 }
   0xd   :  { %371 = vmatpush.msrb.mxu3 %v744_v1 }
   0xe   :  { %174 = vmatpush.msrb.mxu2 %v751_v2  ;;  %306 = vmatpush.msrb.mxu0 %v751_v2 }
   0xf   :  { %372 = vmatpush.msrb.mxu3 %v751_v2 }
  0x10   :  { %175 = vmatpush.msrb.mxu2 %v759_v3  ;;  %307 = vmatpush.msrb.mxu0 %v759_v3 }
  0x11   :  { %373 = vmatpush.msrb.mxu3 %v759_v3 }
  0x86   :  { %v44_v6 = vpop.f32.mrf.mxu0 }
  0x87   :  { %v47_v7 = vadd.f32 %v44_v6, %v15_v5 }
  0x89   :  { %v640_v8 = vmul.f32 -1.442695, %v47_v7 }
  0x8b   :  { %670 = vpow2.f32 %v640_v8 }
  0x91   :  { %v671_v9 = vpop.eup %670 }
  0x92   :  { %v51_v10 = vadd.f32 1.0, %v671_v9 }
  0x94   :  { %672 = vrcp.f32 %v51_v10  ;;  %v63_v14 = vand.u32 2147483648, %v51_v10  ;;  %v61_v16 = vand.u32 2147483647, %v51_v10  ;;  %vm57_vm1 = vweird.f32 %v51_v10 }
  0x96   :  { %v64_v18 = vor.u32 1.1754944e-38, %v63_v14  ;;  %vm62_vm3 = vcmp.eq.f32.partialorder %v61_v16, 8.507059e+37 }
  0x9a   :  { %v673_v11 = vpop.eup %672 }
  0x9b   :  { %v53_v12 = vmul.f32 %v673_v11, %v51_v10  ;;  %vm58_vm0 = vweird.f32 %v673_v11 }
  0x9c   :  { %vm59_vm2 = vmor %vm57_vm1, %vm58_vm0 }
  0x9d   :  { %v54_v13 = vsub.f32 1.0, %v53_v12 }
  0x9f   :  { %v55_v15 = vmul.f32 %v673_v11, %v54_v13 }
  0xa1   :  { %v56_v17 = vadd.f32 %v673_v11, %v55_v15 }
  0xa3   :  { %v60_v19 = vsel %vm59_vm2, %v673_v11, %v56_v17 }
  0xa4   :  { %v65_v20 = vsel %vm62_vm3, %v64_v18, %v60_v19 }
  0xa5   :  { %v67_v21 = vmul.f32 2.0, %v65_v20  ;;  %v69_v25 = vmul.f32 0.0, %v65_v20 }
  0xa7   :  { %v641_v22 = vadd.f32 -1.0, %v67_v21 }
  0xa9   :  { %71 = vrot.lane.b32.xlu0 %v641_v22, %s719_s19 }
 0x11b   :  { %v72_v23 = vpop.permute.xlu0 %71 }
 0x11c   :  { %v74_v24 = vmul.f32 %v72_v23, %v65_v20 }
 0x11e   :  { %76 = vrot.lane.b32.xlu0 %v74_v24, %s720_s20 }
 0x190   :  { %v77_v26 = vpop.permute.xlu0 %76 }
 0x191   :  { %v79_v27 = vadd.f32 %v77_v26, %v69_v25  ;;  %v18_v26 = vld [vmem:[%s946_s0 + $0x6] sm:$0x3] }
 0x193   :  { %674 = vtanh.f32 %v79_v27 }
 0x199   :  { %v675_v28 = vpop.eup %674 }
 0x19a   :  { %82 = vrot.lane.b32.xlu1 %v675_v28, %s719_s19 }
 0x20c   :  { %v83_v29 = vpop.permute.xlu1 %82 }
 0x20d   :  { %v85_v30 = vmul.f32 %v83_v29, %v65_v20 }
 0x20f   :  { %87 = vrot.lane.b32.xlu1 %v85_v30, %s720_s20 }
 0x281   :  { %v88_v31 = vpop.permute.xlu1 %87 }
 0x282   :  { %91 = vst.msk [vmem:[#allocation2] sm:$0x3] %vm90_vm4, %v88_v31  ;;  %642 = vmatmul.msk.f32.vlgmr.msra.gmra.mxu2 %vm23_vm5, %v88_v31 }
 0x283   :  { %436 = vmatpush.msra.mxu2 %v739_v0 }
 0x285   :  { %437 = vmatpush.msra.mxu2 %v744_v1 }
 0x287   :  { %438 = vmatpush.msra.mxu2 %v751_v2 }
 0x289   :  { %439 = vmatpush.msra.mxu2 %v759_v3 }
 0x305   :  { %v111_v33 = vpop.f32.mrf.mxu2 }
 0x306   :  { %v114_v34 = vadd.f32 %v111_v33, %v16_v32 }
 0x308   :  { %v643_v35 = vmul.f32 -1.442695, %v114_v34 }
 0x30a   :  { %676 = vpow2.f32 %v643_v35 }
 0x310   :  { %v677_v36 = vpop.eup %676 }
 0x311   :  { %v118_v37 = vadd.f32 1.0, %v677_v36 }
 0x313   :  { %678 = vrcp.f32 %v118_v37  ;;  %v130_v41 = vand.u32 2147483648, %v118_v37  ;;  %v128_v43 = vand.u32 2147483647, %v118_v37  ;;  %vm124_vm7 = vweird.f32 %v118_v37 }
 0x315   :  { %v131_v45 = vor.u32 1.1754944e-38, %v130_v41  ;;  %vm129_vm9 = vcmp.eq.f32.partialorder %v128_v43, 8.507059e+37 }
 0x319   :  { %v679_v38 = vpop.eup %678 }
 0x31a   :  { %v120_v39 = vmul.f32 %v679_v38, %v118_v37  ;;  %vm125_vm6 = vweird.f32 %v679_v38 }
 0x31b   :  { %vm126_vm8 = vmor %vm124_vm7, %vm125_vm6 }
 0x31c   :  { %v121_v40 = vsub.f32 1.0, %v120_v39 }
 0x31e   :  { %v122_v42 = vmul.f32 %v679_v38, %v121_v40 }
 0x320   :  { %v123_v44 = vadd.f32 %v679_v38, %v122_v42 }
 0x322   :  { %v127_v46 = vsel %vm126_vm8, %v679_v38, %v123_v44 }
 0x323   :  { %v132_v47 = vsel %vm129_vm9, %v131_v45, %v127_v46 }
 0x324   :  { %v134_v48 = vmul.f32 2.0, %v132_v47  ;;  %v136_v52 = vmul.f32 %v132_v47, %v79_v27 }
 0x326   :  { %v644_v49 = vadd.f32 -1.0, %v134_v48  ;;  %v559_v48 = vld [vmem:[%s945_s1 + $0x38] sm:$0xff] }
 0x327   :  { %597 = vmatpush.msra.mxu0 %v559_v48 }
 0x328   :  { %138 = vrot.lane.b32.xlu2 %v644_v49, %s719_s19  ;;  %v558_v49 = vld [vmem:[%s945_s1 + $0x30] sm:$0xff] }
 0x329   :  { %598 = vmatpush.msra.mxu0 %v558_v49 }
 0x382   :  { %v139_v50 = vpop.permute.xlu2 %138 }
 0x383   :  { %v141_v51 = vmul.f32 %v139_v50, %v132_v47  ;;  %v557_v50 = vld [vmem:[%s945_s1 + $0x28] sm:$0xff] }
 0x384   :  { %599 = vmatpush.msra.mxu0 %v557_v50 }
 0x385   :  { %143 = vrot.lane.b32.xlu2 %v141_v51, %s720_s20  ;;  %v556_v51 = vld [vmem:[%s945_s1 + $0x20] sm:$0xff] }
 0x386   :  { %600 = vmatpush.msra.mxu0 %v556_v51 }
 0x3df   :  { %v144_v53 = vpop.permute.xlu2 %143 }
 0x3e0   :  { %v146_v54 = vadd.f32 %v144_v53, %v136_v52  ;;  %v576_v52 = vld [vmem:[%s945_s1 + $0xc0] sm:$0xff]  ;;  %v575_v53 = vld [vmem:[%s945_s1 + $0xb8] sm:$0xff] }
 0x3e1   :  { %611 = vmatpush.msra.mxu1 %v576_v52 }
 0x3e2   :  { %680 = vtanh.f32 %v146_v54 }
 0x3e3   :  { %612 = vmatpush.msra.mxu1 %v575_v53 }
 0x3e8   :  { %v681_v55 = vpop.eup %680 }
 0x3e9   :  { %149 = vrot.lane.b32.xlu0 %v681_v55, %s719_s19  ;;  %v573_v55 = vld [vmem:[%s945_s1 + $0xa8] sm:$0xff] }
 0x45b   :  { %v150_v56 = vpop.permute.xlu0 %149 }
 0x45c   :  { %v152_v57 = vmul.f32 %v150_v56, %v132_v47  ;;  %v572_v56 = vld [vmem:[%s945_s1 + $0xa0] sm:$0xff] }
 0x45e   :  { %154 = vrot.lane.b32.xlu1 %v152_v57, %s720_s20  ;;  %v571_v57 = vld [vmem:[%s945_s1 + $0x98] sm:$0xff] }
 0x4d0   :  { %v155_v58 = vpop.permute.xlu1 %154 }
 0x4d1   :  { %157 = vst.msk [vmem:[#allocation2 + $0x2] sm:$0x3] %vm90_vm4, %v155_v58  ;;  %645 = vmatmul.msk.f32.vlgmr.msrb.gmra.mxu2 %vm23_vm5, %v155_v58  ;;  %v570_v58 = vld [vmem:[%s945_s1 + $0x90] sm:$0xff] }
 0x554   :  { %v177_v60 = vpop.f32.mrf.mxu2 }
 0x555   :  { %v180_v61 = vadd.f32 %v177_v60, %v17_v59  ;;  %v569_v59 = vld [vmem:[%s945_s1 + $0x88] sm:$0xff]  ;;  %v568_v60 = vld [vmem:[%s945_s1 + $0x80] sm:$0xff] }
 0x557   :  { %v646_v62 = vmul.f32 -1.442695, %v180_v61 }
 0x559   :  { %682 = vpow2.f32 %v646_v62 }
 0x55f   :  { %v683_v63 = vpop.eup %682 }
 0x560   :  { %v184_v4 = vadd.f32 1.0, %v683_v63  ;;  %v567_v63 = vld [vmem:[%s945_s1 + $0x78] sm:$0xff] }
 0x562   :  { %684 = vrcp.f32 %v184_v4  ;;  %v196_v8 = vand.u32 2147483648, %v184_v4  ;;  %v194_v10 = vand.u32 2147483647, %v184_v4  ;;  %vm190_vm11 = vweird.f32 %v184_v4 }
 0x564   :  { %v197_v12 = vor.u32 1.1754944e-38, %v196_v8  ;;  %vm195_vm13 = vcmp.eq.f32.partialorder %v194_v10, 8.507059e+37  ;;  %v562_v8 = vld [vmem:[%s945_s1 + $0x50] sm:$0xff]  ;;  %v19_v10 = vld [vmem:[%s946_s0 + $0x8] sm:$0x3] }
 0x568   :  { %v685_v5 = vpop.eup %684 }
 0x569   :  { %v186_v6 = vmul.f32 %v685_v5, %v184_v4  ;;  %vm191_vm10 = vweird.f32 %v685_v5  ;;  %v566_v4 = vld [vmem:[%s945_s1 + $0x70] sm:$0xff] }
 0x56a   :  { %vm192_vm12 = vmor %vm190_vm11, %vm191_vm10 }
 0x56b   :  { %v187_v7 = vsub.f32 1.0, %v186_v6  ;;  %v564_v6 = vld [vmem:[%s945_s1 + $0x60] sm:$0xff] }
 0x56d   :  { %v188_v9 = vmul.f32 %v685_v5, %v187_v7  ;;  %v563_v7 = vld [vmem:[%s945_s1 + $0x58] sm:$0xff] }
 0x56f   :  { %v189_v11 = vadd.f32 %v685_v5, %v188_v9  ;;  %v561_v9 = vld [vmem:[%s945_s1 + $0x48] sm:$0xff] }
 0x571   :  { %v193_v13 = vsel %vm192_vm12, %v685_v5, %v189_v11  ;;  %v565_v5 = vld [vmem:[%s945_s1 + $0x68] sm:$0xff] }
 0x572   :  { %v198_v14 = vsel %vm195_vm13, %v197_v12, %v193_v13 }
 0x573   :  { %v200_v15 = vmul.f32 2.0, %v198_v14  ;;  %v202_v19 = vmul.f32 %v198_v14, %v146_v54  ;;  %v574_v54 = vld [vmem:[%s945_s1 + $0xb0] sm:$0xff] }
 0x574   :  { %613 = vmatpush.msra.mxu1 %v574_v54 }
 0x575   :  { %v647_v16 = vadd.f32 -1.0, %v200_v15 }
 0x576   :  { %614 = vmatpush.msra.mxu1 %v573_v55 }
 0x577   :  { %204 = vrot.lane.b32.xlu2 %v647_v16, %s719_s19 }
 0x578   :  { %615 = vmatpush.msra.mxu1 %v572_v56 }
 0x57a   :  { %616 = vmatpush.msra.mxu1 %v571_v57 }
 0x57c   :  { %617 = vmatpush.msra.mxu1 %v570_v58 }
 0x57e   :  { %618 = vmatpush.msra.mxu1 %v569_v59 }
 0x580   :  { %619 = vmatpush.msra.mxu1 %v568_v60 }
 0x582   :  { %620 = vmatpush.msra.mxu1 %v567_v63 }
 0x584   :  { %621 = vmatpush.msra.mxu1 %v566_v4 }
 0x586   :  { %622 = vmatpush.msra.mxu1 %v565_v5 }
 0x588   :  { %623 = vmatpush.msra.mxu1 %v564_v6 }
 0x58a   :  { %624 = vmatpush.msra.mxu1 %v563_v7  ;;  %v21_v7 = vld [vmem:[%s946_s0 + $0xc] sm:$0x3] }
 0x58c   :  { %625 = vmatpush.msra.mxu1 %v562_v8 }
 0x58e   :  { %626 = vmatpush.msra.mxu1 %v561_v9 }
 0x5d1   :  { %v205_v17 = vpop.permute.xlu2 %204 }
 0x5d2   :  { %v207_v18 = vmul.f32 %v205_v17, %v198_v14 }
 0x5d4   :  { %209 = vrot.lane.b32.xlu0 %v207_v18, %s720_s20 }
 0x646   :  { %v210_v20 = vpop.permute.xlu0 %209 }
 0x647   :  { %v212_v21 = vadd.f32 %v210_v20, %v202_v19 }
 0x649   :  { %686 = vtanh.f32 %v212_v21 }
 0x64f   :  { %v687_v22 = vpop.eup %686 }
 0x650   :  { %215 = vrot.lane.b32.xlu1 %v687_v22, %s719_s19 }
 0x6c2   :  { %v216_v23 = vpop.permute.xlu1 %215 }
 0x6c3   :  { %v218_v24 = vmul.f32 %v216_v23, %v198_v14  ;;  %v894_v14 = vld [vmem:[%s945_s1 + $0x40] ss:$0 sm:$0xff] }
 0x6c5   :  { %220 = vrot.lane.b32.xlu2 %v218_v24, %s720_s20 }
 0x71f   :  { %v221_v25 = vpop.permute.xlu2 %220 }
 0x720   :  { %223 = vst.msk [vmem:[#allocation2 + $0x4] sm:$0x3] %vm90_vm4, %v221_v25  ;;  %648 = vmatmul.msk.f32.vlgmr.msra.gmra.mxu3 %vm23_vm5, %v221_v25 }
 0x721   :  { %502 = vmatpush.msra.mxu3 %v739_v0 }
 0x723   :  { %503 = vmatpush.msra.mxu3 %v744_v1 }
 0x725   :  { %504 = vmatpush.msra.mxu3 %v751_v2 }
 0x727   :  { %505 = vmatpush.msra.mxu3 %v759_v3 }
 0x7a3   :  { %v243_v27 = vpop.f32.mrf.mxu3 }
 0x7a4   :  { %v246_v28 = vadd.f32 %v243_v27, %v18_v26 }
 0x7a6   :  { %v649_v29 = vmul.f32 -1.442695, %v246_v28 }
 0x7a8   :  { %688 = vpow2.f32 %v649_v29 }
 0x7ae   :  { %v689_v30 = vpop.eup %688 }
 0x7af   :  { %v250_v31 = vadd.f32 1.0, %v689_v30 }
 0x7b1   :  { %690 = vrcp.f32 %v250_v31  ;;  %v262_v34 = vand.u32 2147483648, %v250_v31  ;;  %v260_v2 = vand.u32 2147483647, %v250_v31  ;;  %vm256_vm15 = vweird.f32 %v250_v31 }
 0x7b3   :  { %v263_v3 = vor.u32 1.1754944e-38, %v262_v34  ;;  %vm261_vm1 = vcmp.eq.f32.partialorder %v260_v2, 8.507059e+37 }
 0x7b7   :  { %v691_v32 = vpop.eup %690 }
 0x7b8   :  { %v252_v33 = vmul.f32 %v691_v32, %v250_v31  ;;  %vm257_vm14 = vweird.f32 %v691_v32 }
 0x7b9   :  { %vm258_vm0 = vmor %vm256_vm15, %vm257_vm14 }
 0x7ba   :  { %v253_v0 = vsub.f32 1.0, %v252_v33 }
 0x7bc   :  { %v254_v1 = vmul.f32 %v691_v32, %v253_v0 }
 0x7be   :  { %v255_v35 = vadd.f32 %v691_v32, %v254_v1 }
 0x7c0   :  { %v259_v36 = vsel %vm258_vm0, %v691_v32, %v255_v35  ;;  %v901_v32 = vld [vmem:[%s945_s1 + $0xc8] ss:$0 sm:$0xff] }
 0x7c1   :  { %v264_v37 = vsel %vm261_vm1, %v263_v3, %v259_v36 }
 0x7c2   :  { %v266_v38 = vmul.f32 2.0, %v264_v37  ;;  %v268_v42 = vmul.f32 %v264_v37, %v212_v21 }
 0x7c4   :  { %v650_v39 = vadd.f32 -1.0, %v266_v38 }
 0x7c6   :  { %270 = vrot.lane.b32.xlu0 %v650_v39, %s719_s19 }
 0x838   :  { %v271_v40 = vpop.permute.xlu0 %270 }
 0x839   :  { %v273_v41 = vmul.f32 %v271_v40, %v264_v37  ;;  %v20_v40 = vld [vmem:[%s946_s0 + $0xa] sm:$0x3] }
 0x83b   :  { %275 = vrot.lane.b32.xlu1 %v273_v41, %s720_s20 }
 0x8ad   :  { %v276_v43 = vpop.permute.xlu1 %275 }
 0x8ae   :  { %v820_v44 = vadd.f32 %v276_v43, %v268_v42 }
 0x8b0   :  { %692 = vtanh.f32 %v820_v44 }
 0x8b6   :  { %v693_v45 = vpop.eup %692 }
 0x8b7   :  { %281 = vrot.lane.b32.xlu2 %v693_v45, %s719_s19 }
 0x911   :  { %v282_v46 = vpop.permute.xlu2 %281 }
 0x912   :  { %v284_v47 = vmul.f32 %v282_v46, %v264_v37 }
 0x914   :  { %286 = vrot.lane.b32.xlu0 %v284_v47, %s720_s20 }
 0x986   :  { %v287_v61 = vpop.permute.xlu0 %286 }
 0x987   :  { %289 = vst.msk [vmem:[#allocation2 + $0x6] sm:$0x3] %vm90_vm4, %v287_v61  ;;  %651 = vmatmul.msk.f32.vlgmr.msrb.gmra.mxu0 %vm23_vm5, %v287_v61 }
 0x98e   :  { %v554_v62 = vld [vmem:[#allocation2] sm:$0xff] }
 0x98f   :  { %663 = vmatmul.msk.f32.vlgmr.msra.gmra.mxu0 %vm23_vm5, %v554_v62 }
 0xa04   :  { %v309_v11 = vpop.f32.mrf.mxu0 }
 0xa05   :  { %v312_v12 = vadd.f32 %v309_v11, %v19_v10 }
 0xa07   :  { %v652_v13 = vmul.f32 -1.442695, %v312_v12 }
 0xa09   :  { %694 = vpow2.f32 %v652_v13 }
 0xa0c   :  { %v602_v15 = vpop.f32.mrf.mxu0 }
 0xa0d   :  { %v603_v16 = vadd.f32 %v894_v14, %v602_v15 }
 0xa0f   :  { %v695_v17 = vpop.eup %694  ;;  %v608_v18 = vmax.f32 %v603_v16, 0.0 }
 0xa10   :  { %v316_v19 = vadd.f32 1.0, %v695_v17 }
 0xa11   :  { %627 = vmatmul.f32.vlgmr.msra.gmra.mxu1 %v608_v18 }
 0xa12   :  { %696 = vrcp.f32 %v316_v19  ;;  %v328_v23 = vand.u32 2147483648, %v316_v19  ;;  %v326_v25 = vand.u32 2147483647, %v316_v19  ;;  %vm322_vm3 = vweird.f32 %v316_v19 }
 0xa14   :  { %v329_v27 = vor.u32 1.1754944e-38, %v328_v23  ;;  %vm327_vm7 = vcmp.eq.f32.partialorder %v326_v25, 8.507059e+37 }
 0xa18   :  { %v697_v20 = vpop.eup %696 }
 0xa19   :  { %v318_v21 = vmul.f32 %v697_v20, %v316_v19  ;;  %vm323_vm2 = vweird.f32 %v697_v20 }
 0xa1a   :  { %vm324_vm6 = vmor %vm322_vm3, %vm323_vm2 }
 0xa1b   :  { %v319_v22 = vsub.f32 1.0, %v318_v21 }
 0xa1d   :  { %v320_v24 = vmul.f32 %v697_v20, %v319_v22 }
 0xa1f   :  { %v321_v26 = vadd.f32 %v697_v20, %v320_v24 }
 0xa21   :  { %v325_v28 = vsel %vm324_vm6, %v697_v20, %v321_v26 }
 0xa22   :  { %v330_v29 = vsel %vm327_vm7, %v329_v27, %v325_v28 }
 0xa23   :  { %v332_v30 = vmul.f32 2.0, %v330_v29  ;;  %v334_v2 = vmul.f32 %v330_v29, %v820_v44 }
 0xa25   :  { %v653_v31 = vadd.f32 -1.0, %v332_v30 }
 0xa27   :  { %336 = vrot.lane.b32.xlu1 %v653_v31, %s719_s19 }
 0xa8e   :  { %v628_v33 = vpop.f32.mrf.mxu1 }
 0xa8f   :  { %v629_v0 = vadd.f32 %v901_v32, %v628_v33 }
 0xa91   :  { %634 = vst [vmem:[%s947_s2] sm:$0xff] %v629_v0 }
 0xa99   :  { %v337_v34 = vpop.permute.xlu1 %336 }
 0xa9a   :  { %v339_v1 = vmul.f32 %v337_v34, %v330_v29 }
 0xa9c   :  { %341 = vrot.lane.b32.xlu2 %v339_v1, %s720_s20  ;;  %v22_v1 = vld [vmem:[%s946_s0 + $0xe] sm:$0x3] }
 0xaf6   :  { %v342_v35 = vpop.permute.xlu2 %341 }
 0xaf7   :  { %v344_v3 = vadd.f32 %v342_v35, %v334_v2 }
 0xaf9   :  { %698 = vtanh.f32 %v344_v3 }
 0xaff   :  { %v699_v36 = vpop.eup %698 }
 0xb00   :  { %347 = vrot.lane.b32.xlu0 %v699_v36, %s719_s19 }
 0xb72   :  { %v348_v37 = vpop.permute.xlu0 %347 }
 0xb73   :  { %v350_v38 = vmul.f32 %v348_v37, %v330_v29 }
 0xb75   :  { %352 = vrot.lane.b32.xlu1 %v350_v38, %s720_s20 }
 0xbe7   :  { %v353_v39 = vpop.permute.xlu1 %352 }
 0xbe8   :  { %355 = vst.msk [vmem:[#allocation2 + $0x8] sm:$0x3] %vm90_vm4, %v353_v39  ;;  %654 = vmatmul.msk.f32.vlgmr.msrb.gmra.mxu3 %vm23_vm5, %v353_v39 }
 0xc6b   :  { %v375_v41 = vpop.f32.mrf.mxu3 }
 0xc6c   :  { %v378_v42 = vadd.f32 %v375_v41, %v20_v40 }
 0xc6e   :  { %v655_v43 = vmul.f32 -1.442695, %v378_v42 }
 0xc70   :  { %700 = vpow2.f32 %v655_v43 }
 0xc76   :  { %v701_v44 = vpop.eup %700 }
 0xc77   :  { %v382_v45 = vadd.f32 1.0, %v701_v44 }
 0xc79   :  { %702 = vrcp.f32 %v382_v45  ;;  %v394_v49 = vand.u32 2147483648, %v382_v45  ;;  %v392_v51 = vand.u32 2147483647, %v382_v45  ;;  %vm388_vm9 = vweird.f32 %v382_v45 }
 0xc7b   :  { %v395_v53 = vor.u32 1.1754944e-38, %v394_v49  ;;  %vm393_vm11 = vcmp.eq.f32.partialorder %v392_v51, 8.507059e+37 }
 0xc7f   :  { %v703_v46 = vpop.eup %702 }
 0xc80   :  { %v384_v47 = vmul.f32 %v703_v46, %v382_v45  ;;  %vm389_vm8 = vweird.f32 %v703_v46 }
 0xc81   :  { %vm390_vm10 = vmor %vm388_vm9, %vm389_vm8 }
 0xc82   :  { %v385_v48 = vsub.f32 1.0, %v384_v47 }
 0xc84   :  { %v386_v50 = vmul.f32 %v703_v46, %v385_v48 }
 0xc86   :  { %v387_v52 = vadd.f32 %v703_v46, %v386_v50 }
 0xc88   :  { %v391_v54 = vsel %vm390_vm10, %v703_v46, %v387_v52 }
 0xc89   :  { %v396_v55 = vsel %vm393_vm11, %v395_v53, %v391_v54 }
 0xc8a   :  { %v398_v56 = vmul.f32 2.0, %v396_v55  ;;  %v400_v60 = vmul.f32 %v396_v55, %v344_v3 }
 0xc8c   :  { %v656_v57 = vadd.f32 -1.0, %v398_v56 }
 0xc8e   :  { %402 = vrot.lane.b32.xlu2 %v656_v57, %s719_s19 }
 0xce8   :  { %v403_v58 = vpop.permute.xlu2 %402 }
 0xce9   :  { %v405_v59 = vmul.f32 %v403_v58, %v396_v55 }
 0xceb   :  { %407 = vrot.lane.b32.xlu0 %v405_v59, %s720_s20 }
 0xd5d   :  { %v408_v61 = vpop.permute.xlu0 %407 }
 0xd5e   :  { %v410_v62 = vadd.f32 %v408_v61, %v400_v60 }
 0xd60   :  { %704 = vtanh.f32 %v410_v62 }
 0xd66   :  { %v705_v63 = vpop.eup %704 }
 0xd67   :  { %413 = vrot.lane.b32.xlu1 %v705_v63, %s719_s19 }
 0xdd9   :  { %v414_v4 = vpop.permute.xlu1 %413 }
 0xdda   :  { %v416_v5 = vmul.f32 %v414_v4, %v396_v55 }
 0xddc   :  { %418 = vrot.lane.b32.xlu2 %v416_v5, %s720_s20 }
 0xe36   :  { %v419_v6 = vpop.permute.xlu2 %418 }
 0xe37   :  { %421 = vst.msk [vmem:[#allocation2 + $0xa] sm:$0x3] %vm90_vm4, %v419_v6  ;;  %657 = vmatmul.msk.f32.vlgmr.msra.gmra.mxu2 %vm23_vm5, %v419_v6 }
 0xeba   :  { %v441_v8 = vpop.f32.mrf.mxu2 }
 0xebb   :  { %v444_v9 = vadd.f32 %v441_v8, %v21_v7 }
 0xebd   :  { %v658_v10 = vmul.f32 -1.442695, %v444_v9 }
 0xebf   :  { %706 = vpow2.f32 %v658_v10 }
 0xec5   :  { %v707_v11 = vpop.eup %706 }
 0xec6   :  { %v448_v12 = vadd.f32 1.0, %v707_v11 }
 0xec8   :  { %708 = vrcp.f32 %v448_v12  ;;  %v460_v17 = vand.u32 2147483648, %v448_v12  ;;  %v458_v19 = vand.u32 2147483647, %v448_v12  ;;  %vm454_vm13 = vweird.f32 %v448_v12 }
 0xeca   :  { %v461_v21 = vor.u32 1.1754944e-38, %v460_v17  ;;  %vm459_vm15 = vcmp.eq.f32.partialorder %v458_v19, 8.507059e+37 }
 0xece   :  { %v709_v13 = vpop.eup %708 }
 0xecf   :  { %v450_v15 = vmul.f32 %v709_v13, %v448_v12  ;;  %vm455_vm12 = vweird.f32 %v709_v13 }
 0xed0   :  { %vm456_vm14 = vmor %vm454_vm13, %vm455_vm12 }
 0xed1   :  { %v451_v16 = vsub.f32 1.0, %v450_v15 }
 0xed3   :  { %v452_v18 = vmul.f32 %v709_v13, %v451_v16 }
 0xed5   :  { %v453_v20 = vadd.f32 %v709_v13, %v452_v18 }
 0xed7   :  { %v457_v22 = vsel %vm456_vm14, %v709_v13, %v453_v20 }
 0xed8   :  { %v462_v23 = vsel %vm459_vm15, %v461_v21, %v457_v22 }
 0xed9   :  { %v464_v24 = vmul.f32 2.0, %v462_v23  ;;  %v466_v28 = vmul.f32 %v462_v23, %v410_v62 }
 0xedb   :  { %v659_v25 = vadd.f32 -1.0, %v464_v24 }
 0xedd   :  { %468 = vrot.lane.b32.xlu0 %v659_v25, %s719_s19 }
 0xf4f   :  { %v469_v26 = vpop.permute.xlu0 %468 }
 0xf50   :  { %v471_v27 = vmul.f32 %v469_v26, %v462_v23 }
 0xf52   :  { %473 = vrot.lane.b32.xlu1 %v471_v27, %s720_s20 }
 0xfc4   :  { %v474_v29 = vpop.permute.xlu1 %473 }
 0xfc5   :  { %v476_v30 = vadd.f32 %v474_v29, %v466_v28 }
 0xfc7   :  { %710 = vtanh.f32 %v476_v30 }
 0xfcd   :  { %v711_v31 = vpop.eup %710 }
 0xfce   :  { %479 = vrot.lane.b32.xlu2 %v711_v31, %s719_s19 }
0x1028   :  { %v480_v33 = vpop.permute.xlu2 %479 }
0x1029   :  { %v482_v0 = vmul.f32 %v480_v33, %v462_v23 }
0x102b   :  { %484 = vrot.lane.b32.xlu0 %v482_v0, %s720_s20 }
0x109d   :  { %v485_v34 = vpop.permute.xlu0 %484 }
0x109e   :  { %487 = vst.msk [vmem:[#allocation2 + $0xc] sm:$0x3] %vm90_vm4, %v485_v34  ;;  %660 = vmatmul.msk.f32.vlgmr.msra.gmra.mxu3 %vm23_vm5, %v485_v34 }
0x1121   :  { %v507_v2 = vpop.f32.mrf.mxu3 }
0x1122   :  { %v510_v35 = vadd.f32 %v507_v2, %v22_v1 }
0x1124   :  { %v661_v3 = vmul.f32 -1.442695, %v510_v35 }
0x1126   :  { %712 = vpow2.f32 %v661_v3 }
0x112c   :  { %v713_v36 = vpop.eup %712 }
0x112d   :  { %v514_v37 = vadd.f32 1.0, %v713_v36 }
0x112f   :  { %714 = vrcp.f32 %v514_v37  ;;  %v526_v41 = vand.u32 2147483648, %v514_v37  ;;  %v524_v43 = vand.u32 2147483647, %v514_v37  ;;  %vm520_vm1 = vweird.f32 %v514_v37 }
0x1131   :  { %v527_v45 = vor.u32 1.1754944e-38, %v526_v41  ;;  %vm525_vm3 = vcmp.eq.f32.partialorder %v524_v43, 8.507059e+37 }
0x1135   :  { %v715_v38 = vpop.eup %714 }
0x1136   :  { %v516_v39 = vmul.f32 %v715_v38, %v514_v37  ;;  %vm521_vm0 = vweird.f32 %v715_v38 }
0x1137   :  { %vm522_vm2 = vmor %vm520_vm1, %vm521_vm0 }
0x1138   :  { %v517_v40 = vsub.f32 1.0, %v516_v39 }
0x113a   :  { %v518_v42 = vmul.f32 %v715_v38, %v517_v40 }
0x113c   :  { %v519_v44 = vadd.f32 %v715_v38, %v518_v42 }
0x113e   :  { %v523_v46 = vsel %vm522_vm2, %v715_v38, %v519_v44 }
0x113f   :  { %v528_v47 = vsel %vm525_vm3, %v527_v45, %v523_v46 }
0x1140   :  { %v530_v48 = vmul.f32 2.0, %v528_v47  ;;  %v532_v52 = vmul.f32 %v528_v47, %v476_v30 }
0x1142   :  { %v662_v49 = vadd.f32 -1.0, %v530_v48 }
0x1144   :  { %534 = vrot.lane.b32.xlu1 %v662_v49, %s719_s19 }
0x11b6   :  { %v535_v50 = vpop.permute.xlu1 %534 }
0x11b7   :  { %v537_v51 = vmul.f32 %v535_v50, %v528_v47 }
0x11b9   :  { %539 = vrot.lane.b32.xlu2 %v537_v51, %s720_s20 }
0x1213   :  { %v540_v53 = vpop.permute.xlu2 %539 }
0x1214   :  { %v542_v54 = vadd.f32 %v540_v53, %v532_v52 }
0x1216   :  { %716 = vtanh.f32 %v542_v54 }
0x121c   :  { %v717_v55 = vpop.eup %716 }
0x121d   :  { %545 = vrot.lane.b32.xlu0 %v717_v55, %s719_s19 }
0x128f   :  { %v546_v56 = vpop.permute.xlu0 %545 }
0x1290   :  { %v548_v57 = vmul.f32 %v546_v56, %v528_v47 }
0x1292   :  { %550 = vrot.lane.b32.xlu1 %v548_v57, %s720_s20 }
0x1304   :  { %v551_v58 = vpop.permute.xlu1 %550 }
0x1305   :  { %553 = vst.msk [vmem:[#allocation2 + $0xe] sm:$0x3] %vm90_vm4, %v551_v58 }
0x130c   :  { %v555_v59 = vld [vmem:[#allocation2 + $0x8] sm:$0xff] }
0x130d   :  { %664 = vmatmul.msk.f32.gmra.mxu0 %vm23_vm5, %v555_v59 }
0x138a   :  { %v605_v60 = vpop.f32.mrf.mxu0 }
0x138b   :  { %v606_v61 = vadd.f32 %v894_v14, %v605_v60 }
0x138d   :  { %v609_v62 = vmax.f32 %v606_v61, 0.0 }
0x138f   :  { %630 = vmatmul.f32.gmra.mxu1 %v609_v62 }
0x140c   :  { %v631_v63 = vpop.f32.mrf.mxu1 }
0x140d   :  { %v632_v4 = vadd.f32 %v901_v32, %v631_v63 }
0x140f   :  { %635 = vst [vmem:[%s947_s2 + $0x8] sm:$0xff] %v632_v4 }

</bundles_post_ra>
